<compile_context>
chip_gen: v7x
topology: tpu7x:2x2x1
jax: 0.10.0
libtpu: 0.0.40
codegen_flags: <defaults>
</compile_context>

<pallas_src>
import functools

import numpy as np
import jax
import jax.numpy as jnp
from jax.experimental import pallas as pl
from jax.experimental.pallas import tpu as pltpu


def _ant_partial_kernel(o_ref, t_ref, out_ref, *, tile_b, batch, mask_rows):
    """Per-batch-tile sum of squared errors.

    o_ref, t_ref : (TB, S*D)    VMEM input tiles (one batch tile, native dtype)
    out_ref      : (1, 1, S*D)  f32 VMEM output block (this tile's partial sum)
    """
    o = o_ref[...].astype(jnp.float32)
    t = t_ref[...].astype(jnp.float32)
    diff = o - t
    sq = diff * diff                                           # (TB, S*D)  VPU

    if mask_rows:
        # Last tile of a ragged batch: zero rows past the true batch end
        # (the DMA'd pad region may contain stale / undefined data).
        row = jax.lax.broadcasted_iota(jnp.int32, sq.shape, 0)
        global_row = pl.program_id(0) * tile_b + row
        sq = jnp.where(global_row < batch, sq, 0.0)

    out_ref[0] = jnp.sum(sq, axis=0, keepdims=True)            # (1, S*D)


def _vmem_budgets():
    """(input_double_buffer_budget_bytes, vmem_limit_bytes), chip-aware."""
    try:
        cap = pltpu.get_tpu_info().vmem_capacity_bytes
    except Exception:
        cap = 64 * 1024 * 1024            # conservative (v7x-sized) fallback
    input_budget = min(int(cap * 0.60), 96 * 1024 * 1024)
    vmem_limit = min(int(cap * 0.85), 110 * 1024 * 1024)
    return input_budget, vmem_limit


def _pick_tile_b(batch: int, sd: int, itemsize: int, budget_bytes: int) -> int:
    """Largest batch tile s.t. 2 inputs x 2 pipeline buffers fit the budget."""
    lane_pad = ((sd + 127) // 128) * 128
    bytes_per_row = 2 * 2 * itemsize * lane_pad    # 2 inputs * 2 pipeline bufs
    max_tb = max(1, budget_bytes // bytes_per_row)
    if batch <= max_tb:
        return batch                               # whole batch in one tile
    align = 16 if itemsize <= 2 else 8             # sublane packing for bf16
    tb = (max_tb // align) * align
    if tb == 0:                                    # degenerate tiny budget
        tb = min(batch, align)
    return tb


def _lane_inv_weights(S: int, D: int) -> np.ndarray:
    """Per-lane 1/w_i multipliers for the flattened (S*D) axis (host constant)."""
    seq_idx = np.repeat(np.arange(S), D)
    inv_w = np.ones(S * D, dtype=np.float32)
    inv_w[seq_idx < 3] = 0.2                               # w = 5
    inv_w[(seq_idx >= 3) & (seq_idx < 7)] = 5.0            # w = 0.2
    inv_w[(seq_idx >= 7) & (seq_idx < 15)] = 2.0           # w = 0.5
    inv_w[(seq_idx >= 15) & (seq_idx < 21)] = 0.5          # w = 2
    inv_w[(seq_idx >= 21) & (seq_idx < 29)] = 0.2          # w = 5
    return inv_w


def ant_loss(outputs: jax.Array, targets: jax.Array, tile_b: int | None = None):
    """Pallas implementation of AntLoss.forward.

    Args:
      outputs: (B, S, D) array (any float dtype; streamed at native width).
      targets: (B, S, D) array.
      tile_b:  optional batch-tile override (must be a multiple of 8 or == B).

    Returns:
      (total_loss, metrics_dict) — metrics are JAX f32 scalars (the PyTorch
      module calls .item(); callers can float() these if they need host floats).
    """
    assert outputs.shape == targets.shape
    B, S, D = outputs.shape
    SD = S * D

    input_budget, vmem_limit = _vmem_budgets()
    if tile_b is None:
        tile_b = _pick_tile_b(B, SD, outputs.dtype.itemsize, input_budget)
    assert tile_b == B or tile_b % 8 == 0, "tile_b must be 8-aligned or equal B"

    num_tiles = (B + tile_b - 1) // tile_b
    mask_rows = (B % tile_b) != 0

    # Free (contiguous) reshape to a lane-dense 2-D view, native dtype.
    o2 = outputs.reshape(B, SD)
    t2 = targets.reshape(B, SD)

    kernel = functools.partial(_ant_partial_kernel, tile_b=tile_b, batch=B,
                               mask_rows=mask_rows)

    partials = pl.pallas_call(
        kernel,
        out_shape=jax.ShapeDtypeStruct((num_tiles, 1, SD), jnp.float32),
        grid_spec=pltpu.PrefetchScalarGridSpec(
            num_scalar_prefetch=0,
            grid=(num_tiles,),
            in_specs=[
                pl.BlockSpec((tile_b, SD), lambda b: (b, 0)),
                pl.BlockSpec((tile_b, SD), lambda b: (b, 0)),
            ],
            out_specs=pl.BlockSpec((1, 1, SD), lambda b: (b, 0, 0)),
        ),
        compiler_params=pltpu.CompilerParams(
            dimension_semantics=("parallel",),     # independent per-tile partials
            vmem_limit_bytes=vmem_limit,
        ),
    )(o2, t2)

    # ---- tiny epilogue in plain XLA: O(num_tiles*SD + SD) work ----
    per_lane = jnp.sum(partials[:, 0, :], axis=0) * (1.0 / (B * D))   # (SD,)
    weighted = per_lane * jnp.asarray(_lane_inv_weights(S, D))        # (SD,)

    total_loss = jnp.sum(weighted) / S

    def _group(lo_idx, hi_idx, denom):
        lo, hi = lo_idx * D, min(hi_idx * D, SD)
        if lo >= SD:
            return jnp.float32(0.0)
        return jnp.sum(weighted[lo:hi]) / denom

    metrics = {
        "coordinate_loss": _group(0, 3, 3.0),
        "orientation_loss": _group(3, 7, 4.0),
        "angle_loss": _group(7, 15, 8.0),
        "coordinate_velocity_loss": _group(15, 21, 6.0),
        "angular_velocity_loss": _group(21, 29, 8.0),
    }
    return total_loss, metrics


def _reference_ant_loss(outputs, targets):
    """NumPy (float64) reference mirroring the PyTorch loop, for validation."""
    o = np.asarray(outputs, dtype=np.float64)
    t = np.asarray(targets, dtype=np.float64)
    S = o.shape[1]
    total = 0.0
    g = {"coordinate_loss": 0.0, "orientation_loss": 0.0, "angle_loss": 0.0,
         "coordinate_velocity_loss": 0.0, "angular_velocity_loss": 0.0}
    for i in range(S):
        loss = (o[:, i] - t[:, i]) ** 2
        if i in (0, 1, 2):
            loss = loss / 5
            g["coordinate_loss"] += loss.mean()
        elif i in (3, 4, 5, 6):
            loss = loss / 0.2
            g["orientation_loss"] += loss.mean()
        elif i in (7, 8, 9, 10, 11, 12, 13, 14):
            loss = loss / 0.5
            g["angle_loss"] += loss.mean()
        elif i in (15, 16, 17, 18, 19, 20):
            loss = loss / 2
            g["coordinate_velocity_loss"] += loss.mean()
        elif i in (21, 22, 23, 24, 25, 26, 27, 28):
            loss = loss / 5
            g["angular_velocity_loss"] += loss.mean()
        total += loss.mean()
    total /= S
    g["coordinate_loss"] /= 3
    g["orientation_loss"] /= 4
    g["angle_loss"] /= 8
    g["coordinate_velocity_loss"] /= 6
    g["angular_velocity_loss"] /= 8
    return total, g


if __name__ == "__main__":
    key = jax.random.PRNGKey(0)
    k1, k2, k3, k4, k5, k6 = jax.random.split(key, 6)

    S, D = 29, 32   # seq_len = 29 exercises every weight group

    # Config 1: small f32 batch, whole batch in one tile (grid = (1,)).
    B1 = 4
    o1 = jax.random.normal(k1, (B1, S, D), dtype=jnp.float32)
    t1 = jax.random.normal(k2, (B1, S, D), dtype=jnp.float32)
    total1, m1 = ant_loss(o1, t1)

    # Config 2: multi-tile "parallel" batch grid, no masking (16 % 8 == 0).
    B2 = 16
    o2 = jax.random.normal(k3, (B2, S, D), dtype=jnp.float32)
    t2 = jax.random.normal(k4, (B2, S, D), dtype=jnp.float32)
    total2, m2 = ant_loss(o2, t2, tile_b=8)

    # Config 3: ragged batch + native bf16 ingestion (masked last tile).
    B3 = 13
    o3 = jax.random.normal(k5, (B3, S, D), dtype=jnp.float32).astype(jnp.bfloat16)
    t3 = jax.random.normal(k6, (B3, S, D), dtype=jnp.float32).astype(jnp.bfloat16)
    total3, m3 = ant_loss(o3, t3, tile_b=8)

    jax.block_until_ready((total1, total2, total3))

    cases = [
        (o1, t1, total1, m1),
        (o2, t2, total2, m2),
        (o3.astype(jnp.float32), t3.astype(jnp.float32), total3, m3),
    ]
    for (o, t, tot, met) in cases:
        ref_tot, ref_met = _reference_ant_loss(o, t)
        np.testing.assert_allclose(np.asarray(tot), ref_tot, rtol=1e-5, atol=1e-6)
        for name in met:
            np.testing.assert_allclose(np.asarray(met[name]), ref_met[name],
                                       rtol=1e-5, atol=1e-6)

    print("KERNEL_OK")
</pallas_src>

<mosaic_0001>
module attributes {stable_mosaic.version = 11 : i64} {
  func.func @_ant_partial_kernel(%arg0: i32, %arg1: memref<4x928xf32, #tpu.memory_space<vmem>>, %arg2: memref<4x928xf32, #tpu.memory_space<vmem>>, %arg3: memref<1x1x928xf32, #tpu.memory_space<vmem>>) attributes {dimension_semantics = [#tpu.dimension_semantics<parallel>], iteration_bounds = array<i64: 1>, scalar_prefetch = 0 : i64, scratch_operands = 0 : i64, tpu.core_type = #tpu.core_type<tc>, window_params = [{transform_indices = @transform_0, window_bounds = array<i64: 4, 928>}, {transform_indices = @transform_1, window_bounds = array<i64: 4, 928>}, {transform_indices = @transform_2, window_bounds = array<i64: 1, 1, 928>}]} {
    %c0 = arith.constant 0 : index
    %c0_0 = arith.constant 0 : index
    %0 = vector.load %arg1[%c0, %c0_0] : memref<4x928xf32, #tpu.memory_space<vmem>>, vector<4x928xf32>
    %c0_1 = arith.constant 0 : index
    %c0_2 = arith.constant 0 : index
    %1 = vector.load %arg2[%c0_1, %c0_2] : memref<4x928xf32, #tpu.memory_space<vmem>>, vector<4x928xf32>
    %2 = arith.subf %0, %1 : vector<4x928xf32>
    %3 = arith.mulf %2, %2 : vector<4x928xf32>
    %cst = arith.constant dense<0.000000e+00> : vector<928xf32>
    %4 = vector.multi_reduction <add>, %3, %cst [0] : vector<4x928xf32> to vector<928xf32>
    %5 = vector.shape_cast %4 : vector<928xf32> to vector<1x928xf32>
    %c0_3 = arith.constant 0 : index
    %c0_4 = arith.constant 0 : index
    %c0_5 = arith.constant 0 : index
    %6 = vector.load %arg3[%c0_3, %c0_4, %c0_5] : memref<1x1x928xf32, #tpu.memory_space<vmem>>, vector<1x1x928xf32>
    %7 = vector.shape_cast %6 : vector<1x1x928xf32> to vector<1x928xf32>
    %8 = vector.shape_cast %5 : vector<1x928xf32> to vector<1x1x928xf32>
    tpu.vector_store %arg3[%c0_3, %c0_4, %c0_5], %8 {strides = array<i32>} : memref<1x1x928xf32, #tpu.memory_space<vmem>>, vector<1x1x928xf32>,
    return
  }
  func.func @transform_0(%arg0: i32) -> (i32, i32) {
    %c0_i32 = arith.constant 0 : i32
    %c0_i32_0 = arith.constant 0 : i32
    return %arg0, %c0_i32 : i32, i32
  }
  func.func @transform_1(%arg0: i32) -> (i32, i32) {
    %c0_i32 = arith.constant 0 : i32
    %c0_i32_0 = arith.constant 0 : i32
    return %arg0, %c0_i32 : i32, i32
  }
  func.func @transform_2(%arg0: i32) -> (i32, i32, i32) {
    %c0_i32 = arith.constant 0 : i32
    %c0_i32_0 = arith.constant 0 : i32
    %c0_i32_1 = arith.constant 0 : i32
    return %arg0, %c0_i32, %c0_i32_0 : i32, i32, i32
  }
}

</mosaic_0001>

<bundles_post_ra>
// kernel: tpu_custom_call.1
= control target key start
LH: loop header
LB: loop body
LE: loop exit
PB: predicated region body
PF: predicated region fallthrough
CT: control target
= control target key end

     0   :  { %7 = vsyncpa [#allocation3], 0  ;;  %s345_s0 = inlined_call_operand.hbm [shape: f32[4,928], index: 0, kind: input, shape index: {}]   ;;  %s346_s1 = inlined_call_operand.hbm [shape: f32[4,928], index: 1, kind: input, shape index: {}]   ;;  %s347_s2 = inlined_call_operand.hbm [shape: f32[1,1,928], index: 2, kind: output, shape index: {}]  }
   0x1   :  { %8 = vsyncpa [#allocation6], 0 }
   0x2   :  { %9 = vsyncpa [#allocation4], 0  ;;  %s277_s9 = smov [#allocation2]   ;;  %s278_s11 = smov [#allocation5]  }
   0x3   :  { %s16_s10 = sshll.u32 %s277_s9, 4  ;;  %s26_s12 = sshll.u32 %s278_s11, 4  ;;  %s17_s10 = int_to_ptr.vmem [resolvable:$true] %s16_s10  ;;  %s27_s12 = int_to_ptr.vmem [resolvable:$true] %s26_s12 }
   0x4   :  { %s205_s15 = scalar_lea.hbm %s345_s0, 512 }
   0x5   :  { %p206_p0 = scmp.ne.s32.totalorder %s345_s0, %s205_s15  ;;  %p209_p1 = scmp.lt.u32.totalorder %s205_s15, %s345_s0 }
   0x7   :  { %p211_p2 = pnand %p209_p1, %p206_p0 }
   0x9   :  { %214 = shalt.err (!%p211_p2)
}
   0xa   :  { %s215_s20 = scalar_lea.vmem %s17_s10, 512  ;;  %p220_p4 = scmp.lt.s32.totalorder %s17_s10, %s17_s10 }
   0xb   :  { %p216_p3 = scmp.ne.s32.totalorder %s17_s10, %s215_s20  ;;  %p221_p5 = scmp.lt.s32.totalorder %s215_s20, %s215_s20 }
   0xd   :  { %p222_p6 = por %p221_p5, %p220_p4 }
   0xf   :  { %p223_p7 = pnand %p222_p6, %p216_p3 }
  0x11   :  { %226 = shalt.err (!%p223_p7)
}
  0x12   :  { %19 = dma.hbm_to_vmem [thread:$0]  %s345_s0, 512, %s17_s10, [#allocation3]  }
  0x13   :  { %s227_s25 = scalar_lea.hbm %s346_s1, 512 }
  0x14   :  { %p228_p8 = scmp.ne.s32.totalorder %s346_s1, %s227_s25  ;;  %p231_p9 = scmp.lt.u32.totalorder %s227_s25, %s346_s1 }
  0x16   :  { %p233_p10 = pnand %p231_p9, %p228_p8 }
  0x18   :  { %236 = shalt.err (!%p233_p10)
}
  0x19   :  { %s237_s30 = scalar_lea.vmem %s27_s12, 512  ;;  %p242_p12 = scmp.lt.s32.totalorder %s27_s12, %s27_s12 }
  0x1a   :  { %p238_p11 = scmp.ne.s32.totalorder %s27_s12, %s237_s30  ;;  %p243_p13 = scmp.lt.s32.totalorder %s237_s30, %s237_s30 }
  0x1c   :  { %p244_p0 = por %p243_p13, %p242_p12 }
  0x1e   :  { %p245_p1 = pnand %p244_p0, %p238_p11 }
  0x20   :  { %248 = shalt.err (!%p245_p1)
}
  0x21   :  { %29 = dma.hbm_to_vmem [thread:$0]  %s346_s1, 512, %s27_s12, [#allocation6]  }
  0x22   :  { %271 = dma.done.wait [#allocation3], 512  }
  0x23   :  { %272 = vsyncadd [#allocation3], 4294966784 }
  0x24   :  { %273 = dma.done.wait [#allocation6], 512  }
  0x25   :  { %274 = vsyncadd [#allocation6], 4294966784  ;;  %v36_v0 = vld [vmem:[#allocation2] sm:$0xff]  ;;  %v37_v1 = vld [vmem:[#allocation2 + $0x8] sm:$0xff]  ;;  %v279_v6 = vmov 1966171168   ;;  %v137_v8 = vlaneseq }
  0x26   :  { %v38_v2 = vld [vmem:[#allocation2 + $0x10] sm:$0xff]  ;;  %v39_v3 = vld [vmem:[#allocation2 + $0x18] sm:$0xff]  ;;  %v40_v4 = vld [vmem:[#allocation5] sm:$0xff]  ;;  %v320_v7 = vunpack.c.l.s4 %v279_v6  ;;  %vm64_vm0 = vcmask 1043456   ;;  %vm114_vm1 = vcmask 257024   ;;  %s280_s1 = smov [#allocation7]  }
  0x27   :  { %v41_v5 = vld [vmem:[#allocation5 + $0x8] sm:$0xff]  ;;  %v42_v9 = vld [vmem:[#allocation5 + $0x10] sm:$0xff]  ;;  %v43_v10 = vld [vmem:[#allocation5 + $0x18] sm:$0xff]  ;;  %v44_v11 = vsub.f32 %v36_v0, %v40_v4  ;;  %v138_v20 = vshrl.u32 %v137_v8, 7  ;;  %s191_s4 = sshll.u32 %s280_s1, 4  ;;  %vm182_vm2 = vcmp.lt.s32.totalorder %v137_v8, 928  ;;  %s192_s4 = int_to_ptr.vmem [resolvable:$true] %s191_s4 }
  0x28   :  { %v45_v12 = vsub.f32 %v37_v1, %v41_v5  ;;  %v46_v13 = vsub.f32 %v38_v2, %v42_v9  ;;  %v47_v14 = vsub.f32 %v39_v3, %v43_v10  ;;  %v136_v19 = vunpack.c.0.s8 %v320_v7  ;;  %s249_s5 = scalar_lea.vmem %s192_s4, 128  ;;  %p254_p3 = scmp.lt.s32.totalorder %s192_s4, %s192_s4 }
  0x29   :  { %v48_v15 = vmul.f32 %v44_v11, %v44_v11  ;;  %p250_p2 = scmp.ne.s32.totalorder %s192_s4, %s249_s5  ;;  %p255_p4 = scmp.lt.s32.totalorder %s249_s5, %s249_s5 }
  0x2a   :  { %v49_v16 = vmul.f32 %v45_v12, %v45_v12  ;;  %v50_v17 = vmul.f32 %v46_v13, %v46_v13  ;;  %v51_v18 = vmul.f32 %v47_v14, %v47_v14  ;;  %v139_v12 = vsub.s32 %v136_v19, %v138_v20 }
  0x2b   :  { %v56_v21 = vcombine.high %v48_v15, %v48_v15  ;;  %v65_v23 = vsel %vm64_vm0, %v48_v15, 0.0  ;;  %p256_p5 = por %p255_p4, %p254_p3 }
  0x2c   :  { %v57_v22 = vcombine.high %v49_v16, %v49_v16  ;;  %v79_v24 = vsel %vm64_vm0, %v49_v16, 0.0  ;;  %v58_v25 = vcombine.high %v50_v17, %v50_v17  ;;  %v59_v26 = vcombine.high %v51_v18, %v51_v18 }
  0x2d   :  { %v66_v27 = vrot.slane %v65_v23, 4  ;;  %v80_v28 = vrot.slane %v79_v24, 4  ;;  %v72_v29 = vsel %vm64_vm0, %v56_v21, 0.0  ;;  %v93_v31 = vsel %vm64_vm0, %v50_v17, 0.0  ;;  %p257_p6 = pnand %p256_p5, %p250_p2 }
  0x2e   :  { %v86_v30 = vsel %vm64_vm0, %v57_v22, 0.0  ;;  %v107_v32 = vsel %vm64_vm0, %v51_v18, 0.0  ;;  %v73_v34 = vrot.slane %v72_v29, 4  ;;  %v94_v37 = vrot.slane %v93_v31, 4 }
  0x2f   :  { %v67_v33 = vadd.f32 %v66_v27, %v65_v23  ;;  %v81_v35 = vadd.f32 %v80_v28, %v79_v24  ;;  %v87_v36 = vrot.slane %v86_v30, 4  ;;  %v100_v38 = vsel %vm64_vm0, %v58_v25, 0.0 }
  0x30   :  { %v108_v39 = vrot.slane %v107_v32, 4  ;;  %v115_v40 = vsel %vm114_vm1, %v59_v26, 0.0  ;;  %v74_v42 = vadd.f32 %v73_v34, %v72_v29  ;;  %v95_v45 = vadd.f32 %v94_v37, %v93_v31 }
  0x31   :  { %v68_v41 = vrot.slane %v67_v33, 2  ;;  %v82_v43 = vrot.slane %v81_v35, 2  ;;  %v88_v44 = vadd.f32 %v87_v36, %v86_v30  ;;  %v101_v46 = vrot.slane %v100_v38, 4 }
  0x32   :  { %v109_v47 = vadd.f32 %v108_v39, %v107_v32  ;;  %v116_v48 = vrot.slane %v115_v40, 4  ;;  %v75_v50 = vrot.slane %v74_v42, 2  ;;  %v96_v53 = vrot.slane %v95_v45, 2 }
  0x33   :  { %v69_v49 = vadd.f32 %v68_v41, %v67_v33  ;;  %v83_v51 = vadd.f32 %v82_v43, %v81_v35  ;;  %v89_v52 = vrot.slane %v88_v44, 2  ;;  %v102_v54 = vadd.f32 %v101_v46, %v100_v38 }
  0x34   :  { %v110_v55 = vrot.slane %v109_v47, 2  ;;  %v117_v56 = vadd.f32 %v116_v48, %v115_v40  ;;  %v76_v58 = vadd.f32 %v75_v50, %v74_v42  ;;  %v97_v61 = vadd.f32 %v96_v53, %v95_v45 }
  0x35   :  { %v70_v57 = vrot.slane %v69_v49, 1  ;;  %v84_v59 = vrot.slane %v83_v51, 1  ;;  %v90_v60 = vadd.f32 %v89_v52, %v88_v44  ;;  %v103_v62 = vrot.slane %v102_v54, 2 }
  0x36   :  { %v111_v63 = vadd.f32 %v110_v55, %v109_v47  ;;  %v118_v0 = vrot.slane %v117_v56, 2  ;;  %v77_v2 = vrot.slane %v76_v58, 1  ;;  %v98_v5 = vrot.slane %v97_v61, 1 }
  0x37   :  { %v71_v1 = vadd.f32 %v70_v57, %v69_v49  ;;  %v85_v3 = vadd.f32 %v84_v59, %v83_v51  ;;  %v91_v4 = vrot.slane %v90_v60, 1  ;;  %v104_v6 = vadd.f32 %v103_v62, %v102_v54 }
  0x38   :  { %v112_v7 = vrot.slane %v111_v63, 1  ;;  %v119_v9 = vadd.f32 %v118_v0, %v117_v56  ;;  %v78_v10 = vadd.f32 %v77_v2, %v76_v58  ;;  %v99_v13 = vadd.f32 %v98_v5, %v97_v61 }
  0x39   :  { %v92_v11 = vadd.f32 %v91_v4, %v90_v60  ;;  %v105_v14 = vrot.slane %v104_v6, 1 }
  0x3a   :  { %v113_v15 = vadd.f32 %v112_v7, %v111_v63  ;;  %v120_v16 = vrot.slane %v119_v9, 1  ;;  %v130_v17 = vcombine.low %v71_v1, %v78_v10 }
  0x3b   :  { %v131_v18 = vcombine.low %v85_v3, %v92_v11  ;;  %v106_v21 = vadd.f32 %v105_v14, %v104_v6 }
  0x3c   :  { %v121_v22 = vadd.f32 %v120_v16, %v119_v9  ;;  %v140_v23 = vrot.slane %v130_v17, %v139_v12 }
  0x3d   :  { %v147_v24 = vrot.slane %v131_v18, %v139_v12  ;;  %v132_v25 = vcombine.low %v99_v13, %v106_v21 }
  0x3e   :  { %v133_v26 = vcombine.low %v113_v15, %v121_v22 }
  0x3f   :  { %v162_v27 = vcombine.low %v140_v23, %v147_v24  ;;  %v154_v28 = vrot.slane %v132_v25, %v139_v12 }
  0x40   :  { %v161_v29 = vrot.slane %v133_v26, %v139_v12 }
  0x41   :  { %v170_v31 = vrot.slane %v162_v27, %v139_v12 }
  0x42   :  { %v163_v30 = vcombine.low %v154_v28, %v161_v29 }
  0x44   :  { %v177_v19 = vrot.slane %v163_v30, %v139_v12 }
  0x46   :  { %v178_v20 = vcombine.low %v170_v31, %v177_v19 }
  0x48   :  { %184 = vst.msk [vmem:[#allocation7] sm:$0xff] %vm182_vm2, %v178_v20 }
  0x49   :  { %260 = shalt.err (!%p257_p6)
}
  0x4a   :  { %s261_s8 = scalar_lea.hbm %s347_s2, 128 }
  0x4b   :  { %p262_p7 = scmp.ne.s32.totalorder %s347_s2, %s261_s8  ;;  %p265_p8 = scmp.lt.u32.totalorder %s261_s8, %s347_s2 }
  0x4d   :  { %p267_p9 = pnand %p265_p8, %p262_p7 }
  0x4f   :  { %270 = shalt.err (!%p267_p9)
}
  0x50   :  { %194 = dma.vmem_to_hbm [thread:$0]  %s192_s4, 128, %s347_s2, [#allocation4]  }
  0x51   :  { %275 = dma.done.wait [#allocation4], 128  }
  0x52   :  { %276 = vsyncadd [#allocation4], 4294967168 }
  0x53   :  { %198 = vsyncpa [#allocation3], 1 }
  0x54   :  { %199 = vsyncpa [#allocation6], 1 }
  0x55   :  { %200 = vsyncpa [#allocation4], 1 }

</bundles_post_ra>
